<compile_context>
chip_gen: v7x
topology: tpu7x:2x2x1
jax: 0.10.0
libtpu: 0.0.40
codegen_flags: <defaults>
</compile_context>

<pallas_src>
import functools

import jax
import jax.numpy as jnp
from jax.experimental import pallas as pl
from jax.experimental.pallas import tpu as pltpu


def _ilif_kernel(x_ref, s_ref, u_ref, m_ref, *, gamma, v_th):
    """One (row-block, timestep) grid point of the LIF recurrence.

    u/m state lives in f32 VMEM scratch, persists across the innermost
    ("arbitrary") time axis, and is reset at t == 0 of each row block.
    """
    t = pl.program_id(1)

    @pl.when(t == 0)
    def _():
        u_ref[...] = jnp.zeros_like(u_ref)
        m_ref[...] = jnp.zeros_like(m_ref)

    x = x_ref[0].astype(jnp.float32)                     # (br, 128)
    u = gamma * u_ref[...] + x
    spike = u >= v_th                                    # bool mask (Rectangle fwd)
    spike_f = jnp.where(spike, 1.0, 0.0)
    # sigmoid(z) == 0.5*tanh(0.5*z) + 0.5  -> single EUP push per sigmoid.
    sig_u = 0.5 * jnp.tanh((0.5 * (1.0 - gamma)) * u) + 0.5
    # In-place torch.sigmoid_(m): carried state = sigmoid(m*sig((1-g)u) + spike).
    m = 0.5 * jnp.tanh(0.5 * (m_ref[...] * sig_u + spike_f)) + 0.5
    u_ref[...] = u - jnp.where(spike, v_th + m, 0.0)
    m_ref[...] = m
    s_ref[0] = spike_f.astype(s_ref.dtype)


def _num_tensorcores():
    """Best-effort TensorCores per device (v7x / megacore chips have 2)."""
    try:
        kind = jax.devices()[0].device_kind.lower()
    except Exception:
        return 1
    for tag in ("v7", "v4", "v5p"):
        if tag in kind:
            return 2
    return 1


def ilif_spike(x_seq, tau, *, block_rows=None):
    """Pallas implementation of ILIFSpike.forward. x_seq: (T, ...)."""
    gamma = 1.0 - 1.0 / tau
    v_th = 1.0

    T = x_seq.shape[0]
    trailing = x_seq.shape[1:]
    N = 1
    for d in trailing:
        N *= d

    lane = 128
    M = int(pl.cdiv(N, lane))
    n_pad = M * lane

    itemsize = jnp.dtype(x_seq.dtype).itemsize
    sub = {4: 8, 2: 16, 1: 32}.get(itemsize, 8)          # dtype sublane multiple

    if block_rows is None:
        # ~2 MiB input tile per grid step: per-step DMA time >> 0.35 us fixed
        # overhead on every generation, while the total VMEM footprint
        # (2x in + 2x out + 2x f32 state) stays in the 12-16 MiB range.
        block_rows = (2 * 1024 * 1024) // (lane * itemsize)

    # Flatten non-time dims to a lane-dense (T, M, 128) slab. Padding only
    # happens when N is not already a multiple of 128.
    # TODO(synk): for ragged N this pad (and the slice below) costs an extra
    # full HBM pass; handle the tail block with in-kernel masking to avoid it.
    xf = x_seq.reshape(T, N)
    if n_pad != N:
        xf = jnp.pad(xf, ((0, 0), (0, n_pad - N)))
    x3 = xf.reshape(T, M, lane)

    ncores = _num_tensorcores()
    if ncores > 1 and M >= 2 * sub:
        # Multi-TensorCore chip: make the number of row blocks a multiple of the
        # core count so the "parallel" axis keeps every core busy.
        blocks = max(ncores, int(pl.cdiv(M, block_rows)))
        blocks = int(pl.cdiv(blocks, ncores)) * ncores
        br = int(pl.cdiv(int(pl.cdiv(M, blocks)), sub)) * sub
        br = min(br, M)
    else:
        # Single TensorCore (v5e/v6e): one maximal tile per row block — splitting
        # the parallel axis only multiplies per-grid-step pipeline overhead.
        br = min(block_rows, M)
        if br < M:
            br = max(sub, (br // sub) * sub)
    grid_i = int(pl.cdiv(M, br))

    kernel = functools.partial(_ilif_kernel, gamma=gamma, v_th=v_th)

    # Explicit scoped-VMEM limit: double-buffered in/out tiles + two f32 state
    # buffers + headroom (v5e's scoped default is only 16 MiB).
    tile_elems = br * lane
    vmem_need = tile_elems * (2 * itemsize + 2 * itemsize + 2 * 4)
    vmem_limit = int(min(max(vmem_need + (8 << 20), 16 << 20), 48 << 20))

    cost = pl.CostEstimate(
        flops=14 * T * n_pad,                 # ~14 VPU ops / element / step
        transcendentals=2 * T * n_pad,        # 2 tanh (EUP) / element / step
        bytes_accessed=2 * T * n_pad * itemsize,
    )

    out = pl.pallas_call(
        kernel,
        out_shape=jax.ShapeDtypeStruct((T, M, lane), x_seq.dtype),
        grid_spec=pltpu.PrefetchScalarGridSpec(
            num_scalar_prefetch=0,
            grid=(grid_i, T),                              # T innermost (recurrence)
            # TODO(synk): if v7x profiling shows exposed DMA per step, sweep
            # pipeline_mode=pl.Buffered(3) on the input spec.
            in_specs=[pl.BlockSpec((1, br, lane), lambda i, t: (t, i, 0))],
            out_specs=pl.BlockSpec((1, br, lane), lambda i, t: (t, i, 0)),
            scratch_shapes=[pltpu.VMEM((br, lane), jnp.float32),   # u state
                            pltpu.VMEM((br, lane), jnp.float32)],  # m state
        ),
        compiler_params=pltpu.CompilerParams(
            dimension_semantics=("parallel", "arbitrary"),
            vmem_limit_bytes=vmem_limit),
        cost_estimate=cost,
    )(x3)

    out = out.reshape(T, n_pad)
    if n_pad != N:
        out = out[:, :N]
    return out.reshape((T,) + trailing)


def ilif_spike_ref(x_seq, tau):
    """Pure-JAX reference (mirrors the PyTorch loop, incl. in-place sigmoid_ on m)."""
    gamma = 1.0 - 1.0 / tau
    v_th = 1.0

    def step(carry, x):
        u, m = carry
        u = gamma * u + x
        s = (u - v_th >= 0.0).astype(x.dtype)
        m = jax.nn.sigmoid(m * jax.nn.sigmoid((1.0 - gamma) * u) + s)
        u = u - s * (v_th + m)
        return (u, m), s

    init = (jnp.zeros_like(x_seq[0]), jnp.zeros_like(x_seq[0]))
    _, spikes = jax.lax.scan(step, init, x_seq)
    return spikes


if __name__ == "__main__":
    # ILIFSpike has no learned parameters; only the hyper-parameter tau.
    tau = 2.0

    T, B, C, H, W = 8, 2, 4, 16, 16
    key = jax.random.PRNGKey(0)
    x_seq = jax.random.normal(key, (T, B, C, H, W), dtype=jnp.float32) * 1.5

    out = ilif_spike(x_seq, tau)
    out = jax.block_until_ready(out)

    ref = jax.block_until_ready(ilif_spike_ref(x_seq, tau))
    assert out.shape == x_seq.shape
    assert out.dtype == x_seq.dtype
    assert jnp.allclose(out, ref, atol=1e-5), "mismatch vs reference"

    print("KERNEL_OK")
</pallas_src>

<mosaic_0001>
module attributes {stable_mosaic.version = 11 : i64} {
  func.func @_ilif_kernel(%arg0: i32, %arg1: i32, %arg2: memref<1x16x128xf32, #tpu.memory_space<vmem>>, %arg3: memref<1x16x128xf32, #tpu.memory_space<vmem>>, %arg4: memref<16x128xf32, #tpu.memory_space<vmem>>, %arg5: memref<16x128xf32, #tpu.memory_space<vmem>>) attributes {dimension_semantics = [#tpu.dimension_semantics<parallel>, #tpu.dimension_semantics<arbitrary>], iteration_bounds = array<i64: 1, 8>, scalar_prefetch = 0 : i64, scratch_operands = 2 : i64, tpu.core_type = #tpu.core_type<tc>, window_params = [{transform_indices = @transform_0, window_bounds = array<i64: 1, 16, 128>}, {transform_indices = @transform_1, window_bounds = array<i64: 1, 16, 128>}]} {
    %c0_i32 = arith.constant 0 : i32
    %0 = arith.cmpi eq, %arg1, %c0_i32 : i32
    %1 = arith.extui %0 : i1 to i32
    %c0_i32_0 = arith.constant 0 : i32
    %2 = arith.cmpi ne, %1, %c0_i32_0 : i32
    scf.if %2 {
      %cst_25 = arith.constant 0.000000e+00 : f32
      %41 = vector.broadcast %cst_25 : f32 to vector<16x128xf32>
      %c0_26 = arith.constant 0 : index
      %c0_27 = arith.constant 0 : index
      %42 = vector.load %arg4[%c0_26, %c0_27] : memref<16x128xf32, #tpu.memory_space<vmem>>, vector<16x128xf32>
      tpu.vector_store %arg4[%c0_26, %c0_27], %41 {strides = array<i32>} : memref<16x128xf32, #tpu.memory_space<vmem>>, vector<16x128xf32>,
      %cst_28 = arith.constant 0.000000e+00 : f32
      %43 = vector.broadcast %cst_28 : f32 to vector<16x128xf32>
      %c0_29 = arith.constant 0 : index
      %c0_30 = arith.constant 0 : index
      %44 = vector.load %arg5[%c0_29, %c0_30] : memref<16x128xf32, #tpu.memory_space<vmem>>, vector<16x128xf32>
      tpu.vector_store %arg5[%c0_29, %c0_30], %43 {strides = array<i32>} : memref<16x128xf32, #tpu.memory_space<vmem>>, vector<16x128xf32>,
    } else {
    }
    %c0 = arith.constant 0 : index
    %c0_1 = arith.constant 0 : index
    %c0_2 = arith.constant 0 : index
    %3 = vector.load %arg2[%c0, %c0_1, %c0_2] : memref<1x16x128xf32, #tpu.memory_space<vmem>>, vector<1x16x128xf32>
    %4 = vector.shape_cast %3 : vector<1x16x128xf32> to vector<16x128xf32>
    %c0_3 = arith.constant 0 : index
    %c0_4 = arith.constant 0 : index
    %5 = vector.load %arg4[%c0_3, %c0_4] : memref<16x128xf32, #tpu.memory_space<vmem>>, vector<16x128xf32>
    %cst = arith.constant 5.000000e-01 : f32
    %6 = vector.broadcast %cst : f32 to vector<16x128xf32>
    %7 = arith.mulf %6, %5 : vector<16x128xf32>
    %8 = arith.addf %7, %4 : vector<16x128xf32>
    %cst_5 = arith.constant 1.000000e+00 : f32
    %9 = vector.broadcast %cst_5 : f32 to vector<16x128xf32>
    %10 = arith.cmpf oge, %8, %9 : vector<16x128xf32>
    %cst_6 = arith.constant 1.000000e+00 : f32
    %cst_7 = arith.constant 0.000000e+00 : f32
    %11 = vector.broadcast %cst_6 : f32 to vector<16x128xf32>
    %12 = vector.broadcast %cst_7 : f32 to vector<16x128xf32>
    %13 = arith.select %10, %11, %12 : vector<16x128xi1>, vector<16x128xf32>
    %cst_8 = arith.constant 2.500000e-01 : f32
    %14 = vector.broadcast %cst_8 : f32 to vector<16x128xf32>
    %15 = arith.mulf %14, %8 : vector<16x128xf32>
    %16 = math.tanh %15 : vector<16x128xf32>
    %cst_9 = arith.constant 5.000000e-01 : f32
    %17 = vector.broadcast %cst_9 : f32 to vector<16x128xf32>
    %18 = arith.mulf %17, %16 : vector<16x128xf32>
    %cst_10 = arith.constant 5.000000e-01 : f32
    %19 = vector.broadcast %cst_10 : f32 to vector<16x128xf32>
    %20 = arith.addf %18, %19 : vector<16x128xf32>
    %c0_11 = arith.constant 0 : index
    %c0_12 = arith.constant 0 : index
    %21 = vector.load %arg5[%c0_11, %c0_12] : memref<16x128xf32, #tpu.memory_space<vmem>>, vector<16x128xf32>
    %22 = arith.mulf %21, %20 : vector<16x128xf32>
    %23 = arith.addf %22, %13 : vector<16x128xf32>
    %cst_13 = arith.constant 5.000000e-01 : f32
    %24 = vector.broadcast %cst_13 : f32 to vector<16x128xf32>
    %25 = arith.mulf %24, %23 : vector<16x128xf32>
    %26 = math.tanh %25 : vector<16x128xf32>
    %cst_14 = arith.constant 5.000000e-01 : f32
    %27 = vector.broadcast %cst_14 : f32 to vector<16x128xf32>
    %28 = arith.mulf %27, %26 : vector<16x128xf32>
    %cst_15 = arith.constant 5.000000e-01 : f32
    %29 = vector.broadcast %cst_15 : f32 to vector<16x128xf32>
    %30 = arith.addf %28, %29 : vector<16x128xf32>
    %cst_16 = arith.constant 1.000000e+00 : f32
    %31 = vector.broadcast %cst_16 : f32 to vector<16x128xf32>
    %32 = arith.addf %31, %30 : vector<16x128xf32>
    %cst_17 = arith.constant 0.000000e+00 : f32
    %33 = vector.broadcast %cst_17 : f32 to vector<16x128xf32>
    %34 = arith.select %10, %32, %33 : vector<16x128xi1>, vector<16x128xf32>
    %35 = arith.subf %8, %34 : vector<16x128xf32>
    %c0_18 = arith.constant 0 : index
    %c0_19 = arith.constant 0 : index
    %36 = vector.load %arg4[%c0_18, %c0_19] : memref<16x128xf32, #tpu.memory_space<vmem>>, vector<16x128xf32>
    tpu.vector_store %arg4[%c0_18, %c0_19], %35 {strides = array<i32>} : memref<16x128xf32, #tpu.memory_space<vmem>>, vector<16x128xf32>,
    %c0_20 = arith.constant 0 : index
    %c0_21 = arith.constant 0 : index
    %37 = vector.load %arg5[%c0_20, %c0_21] : memref<16x128xf32, #tpu.memory_space<vmem>>, vector<16x128xf32>
    tpu.vector_store %arg5[%c0_20, %c0_21], %30 {strides = array<i32>} : memref<16x128xf32, #tpu.memory_space<vmem>>, vector<16x128xf32>,
    %c0_22 = arith.constant 0 : index
    %c0_23 = arith.constant 0 : index
    %c0_24 = arith.constant 0 : index
    %38 = vector.load %arg3[%c0_22, %c0_23, %c0_24] : memref<1x16x128xf32, #tpu.memory_space<vmem>>, vector<1x16x128xf32>
    %39 = vector.shape_cast %38 : vector<1x16x128xf32> to vector<16x128xf32>
    %40 = vector.shape_cast %13 : vector<16x128xf32> to vector<1x16x128xf32>
    tpu.vector_store %arg3[%c0_22, %c0_23, %c0_24], %40 {strides = array<i32>} : memref<1x16x128xf32, #tpu.memory_space<vmem>>, vector<1x16x128xf32>,
    return
  }
  func.func @transform_0(%arg0: i32, %arg1: i32) -> (i32, i32, i32) {
    %c0_i32 = arith.constant 0 : i32
    %c0_i32_0 = arith.constant 0 : i32
    return %arg1, %arg0, %c0_i32 : i32, i32, i32
  }
  func.func @transform_1(%arg0: i32, %arg1: i32) -> (i32, i32, i32) {
    %c0_i32 = arith.constant 0 : i32
    %c0_i32_0 = arith.constant 0 : i32
    return %arg1, %arg0, %c0_i32 : i32, i32, i32
  }
}

</mosaic_0001>

<bundles_post_ra>
// kernel: tpu_custom_call.1
= control target key start
LH: loop header
LB: loop body
LE: loop exit
PB: predicated region body
PF: predicated region fallthrough
CT: control target
= control target key end

     0   :  { %6 = vsyncpa [#allocation5], 0  ;;  %s735_s0 = inlined_call_operand.hbm [shape: f32[8,16,128], index: 0, kind: input, shape index: {}]   ;;  %s736_s1 = inlined_call_operand.hbm [shape: f32[8,16,128], index: 1, kind: output, shape index: {}]  }
   0x1   :  { %8 = vsyncpa [#allocation5 + $0x1], 0 }
   0x2   :  { %9 = vsyncpa [#allocation6], 0 }
   0x3   :  { %11 = vsyncpa [#allocation6 + $0x1], 0  ;;  %s538_s6 = smov 0   ;;  %s540_s7 = smov 0  }
   0x4   :  { %s542_s8 = smov 0   ;;  %s544_s9 = smov 0  }
   0x5   :  { %s546_s10 = smov 0   ;;  %s548_s11 = smov 0  }
   0x6 LB: > { %s312_s12 = sadd.s32 4294967295, %s518_s11   ;;  %s313_s13 = sadd.s32 4294967294, %s518_s11   ;;  %s518_s11 = sphi %s548_s11, %s17_s11   ;;  %s514_s10 = sphi %s546_s10, %s750_s10   ;;  %s510_s9 = sphi %s544_s9, %s749_s9   ;;  %s506_s8 = sphi %s542_s8, %s748_s8   ;;  %s502_s7 = sphi %s540_s7, %s747_s7   ;;  %s498_s6 = sphi %s538_s6, %s746_s6  }
   0x7   : > { %s26_s14 = sadd.s32 1, %s514_s10  ;;  %s38_s15 = sadd.s32 1, %s506_s8 }
   0x8   : > { %p27_p0 = scmp.ge.s32.totalorder %s26_s14, 8  ;;  %p45_p1 = scmp.ne.s32.totalorder %s506_s8, %s502_s7 }
   0x9   : > { %p46_p2 = scmp.eq.s32.totalorder %s518_s11, 0  ;;  %p51_p3 = scmp.ne.s32.totalorder %s502_s7, %s498_s6 }
   0xa   : > { %s752_s14 = smov (%p27_p0, %s26_s14), 0  ;;  %p52_p5 = scmp.eq.s32.totalorder %s312_s12, 0 }
   0xb   : > { %p579_p4 = por %p46_p2, %p45_p1  ;;  %s33_s17 = ssub.s32 %s514_s10, %s752_s14 }
   0xc   : > { %p77_p6 = scmp.eq.s32.totalorder %s312_s12, 7  ;;  %p36_p7 = scmp.eq.s32.totalorder %s33_s17, 0 }
   0xd   : > { %p585_p8 = por %p52_p5, %p51_p3  ;;  %p83_p10 = scmp.eq.s32.totalorder %s313_s13, 7 }
   0xe   : > { %p589_p9 = por %p77_p6, %p45_p1  ;;  %p342_p12 = scmp.lt.s32.totalorder %s518_s11, 8 }
   0xf   : > { %s594_s20 = scalar_select %p36_p7, %s506_s8, %s38_s15  }
  0x10   : > { %s740_s19 = scalar_select %p589_p9, 1, 0 }
  0x11   : > { %p596_p11 = por %p83_p10, %p51_p3  ;;  %s103_s22 = sand.u32 1, %s506_s8  }
  0x12   : > { %s316_s23 = sshll.u32 %s103_s22, 4  ;;  %s328_s24 = sshll.u32 %s514_s10, 8 }
  0x13   : > { %s741_s21 = scalar_select %p596_p11, 1, 0 }
  0x14   : > { %s606_s27 = scalar_lea.hbm %s735_s0, %s328_s24  ;;  %s107_s28 = scalar_lea.vmem [#allocation4], %s316_s23 }
  0x15   : > { %s116_s29 = sshll.u32 %s107_s28, 4  ;;  %p612_p13 = pnand %p342_p12, %p579_p4  ;;  %s608_s29 = int_to_ptr.vmem [resolvable:$true] %s116_s29 }
  0x16   : > { %s617_s2 = scalar_lea.sflag [#allocation5], %s103_s22  ;;  %s406_s3 = scalar_lea.hbm %s606_s27, 256 }
  0x17   : > { %p407_p1 = scmp.ne.s32.totalorder %s606_s27, %s406_s3  ;;  %p408_p2 = pneg %p612_p13 }
  0x18   : > { %s411_s12 = scalar_lea.hbm %s735_s0, 2048  ;;  %p412_p4 = scmp.lt.u32.totalorder %s606_s27, %s735_s0 }
  0x19   : > { %p409_p3 = pnand %p408_p2, %p407_p1  ;;  %p413_p6 = scmp.lt.u32.totalorder %s411_s12, %s406_s3 }
  0x1a   : > { %p415_p10 = scmp.lt.u32.totalorder %s406_s3, %s606_s27 }
  0x1b   : > { %p410_p5 = pneg %p409_p3  ;;  %p414_p7 = por %p413_p6, %p412_p4 }
  0x1d   : > { %p416_p12 = por %p415_p10, %p414_p7 }
  0x1f   : > { %p417_p0 = pnand %p416_p12, %p410_p5 }
  0x21   : > { %420 = shalt.err (!%p417_p0)
}
  0x22   : > { %s421_s16 = scalar_lea.vmem %s608_s29, 256  ;;  %s520_s17 = smov [#allocation4]  }
  0x23   : > { %p422_p1 = scmp.ne.s32.totalorder %s608_s29, %s421_s16  ;;  %s426_s22 = sshll.u32 %s520_s17, 4  ;;  %s427_s22 = int_to_ptr.vmem [resolvable:$false] %s426_s22 }
  0x24   : > { %s428_s23 = scalar_lea.vmem %s427_s22, 512  ;;  %p429_p9 = scmp.lt.s32.totalorder %s608_s29, %s427_s22 }
  0x25   : > { %p424_p3 = pnand %p422_p1, %p408_p2  ;;  %p430_p4 = scmp.lt.s32.totalorder %s428_s23, %s421_s16 }
  0x27   : > { %p425_p11 = pneg %p424_p3  ;;  %p431_p6 = por %p430_p4, %p429_p9 }
  0x29   : > { %p432_p7 = pnand %p431_p6, %p425_p11 }
  0x2b   : > { %435 = shalt.err (!%p432_p7)
}
  0x2c   : > { %s521_s24 = smov 128   ;;  %s522_s25 = smov 8  }
  0x2d   : > { %337 = dma.hbm_to_vmem [thread:$0]  (!%p612_p13), %s606_s27, 256, %s608_s29, %s617_s2, %s521_s24, %s521_s24, %s522_s25  }
  0x2e   : > { %p124_p0 = scmp.lt.s32.totalorder %s518_s11, 9  ;;  %p743_p2 = scmp.ge.s32.totalorder %s518_s11, 1 }
  0x30   : > { %p125_p5 = pnand %p743_p2, %p124_p0 }
  0x31   : > { %s649_s26 = sand.u32 (!%p125_p5), 1, %s502_s7  }
  0x32   : > { %128 = sbr.rel (%p125_p5) target bundleno = 124 (0x7c), region = 24  ;;  %s320_s28 = sshll.u32 (!%p125_p5), %s649_s26, 4 }
  0x33   : > { %s131_s3 = scalar_lea.sflag (!%p125_p5), [#allocation5], %s649_s26  ;;  %s134_s4 = scalar_lea.vmem (!%p125_p5), [#allocation4], %s320_s28 }
  0x39   : > { %489 = dma.done.wait (%p585_p8), %s131_s3, 256  }
  0x3a   : > { %491 = vsyncadd (%p585_p8), %s131_s3, 4294967040  ;;  %s657_s30 = scalar_lea.vmem [#allocation7], %s320_s28  ;;  %p322_p9 = scmp.ne.s32.totalorder %s510_s9, 0 }
  0x3b   : > { %v523_v0 = vmov (!%p322_p9), 0.0  }
  0x3c   : > { %158 = sbr.rel (%p322_p9) target bundleno = 67 (0x43), region = 32  ;;  %159 = vst [vmem:[#allocation2] sm:$0xff] (!%p322_p9), %v523_v0  ;;  %160 = vst [vmem:[#allocation2 + $0x8] sm:$0xff] (!%p322_p9), %v523_v0 }
  0x3d   : > { %161 = vst [vmem:[#allocation3] sm:$0xff] (!%p322_p9), %v523_v0  ;;  %162 = vst [vmem:[#allocation3 + $0x8] sm:$0xff] (!%p322_p9), %v523_v0 }
  0x43 PF: > { %v163_v1 = vld [vmem:[%s134_s4] sm:$0xff]  ;;  %v164_v4 = vld [vmem:[%s134_s4 + $0x8] sm:$0xff]  ;;  %s329_s18 = sshll.u32 %s510_s9, 8  ;;  %s225_s27 = sshll.u32 %s657_s30, 4  ;;  %v524_v10 = vmov 0.0   ;;  %s673_s27 = int_to_ptr.vmem [resolvable:$true] %s225_s27 }
  0x44   : > { %v165_v2 = vld [vmem:[#allocation2] sm:$0xff]  ;;  %v166_v5 = vld [vmem:[#allocation2 + $0x8] sm:$0xff]  ;;  %s671_s5 = scalar_lea.hbm %s736_s1, %s329_s18  ;;  %s210_s9 = scalar_lea.sflag [#allocation6], %s649_s26 }
  0x45   : > { %v167_v3 = vmul.f32 0.5, %v165_v2  ;;  %v168_v6 = vmul.f32 0.5, %v166_v5  ;;  %s436_s12 = scalar_lea.vmem %s673_s27, 256  ;;  %p744_p11 = scmp.ne.s32.totalorder %s740_s19, 0 }
  0x46   : > { %p437_p8 = scmp.ne.s32.totalorder %s673_s27, %s436_s12  ;;  %s525_s13 = smov [#allocation7]  }
  0x47   : > { %v662_v7 = vadd.f32 %v167_v3, %v163_v1  ;;  %v664_v8 = vadd.f32 %v168_v6, %v164_v4  ;;  %s440_s15 = sshll.u32 %s525_s13, 4  ;;  %s441_s15 = int_to_ptr.vmem [resolvable:$false] %s440_s15 }
  0x48   : > { %p438_p13 = pnand %p437_p8, %p744_p11  ;;  %s442_s16 = scalar_lea.vmem %s441_s15, 512 }
  0x49   : > { %vm171_vm0 = vcmp.ge.f32.partialorder %v662_v7, 1.0  ;;  %v175_v9 = vmul.f32 0.25, %v662_v7  ;;  %vm172_vm1 = vcmp.ge.f32.partialorder %v664_v8, 1.0  ;;  %v176_v12 = vmul.f32 0.25, %v664_v8  ;;  %p443_p12 = scmp.lt.s32.totalorder %s673_s27, %s441_s15  ;;  %p444_p1 = scmp.lt.s32.totalorder %s442_s16, %s436_s12 }
  0x4a   : > { %v173_v11 = vsel %vm171_vm0, 1.0, %v524_v10  ;;  %v174_v13 = vsel %vm172_vm1, 1.0, %v524_v10  ;;  %p439_p10 = pneg %p438_p13 }
  0x4b   : > { %398 = vtanh.f32 %v175_v9  ;;  %207 = vst [vmem:[%s657_s30] sm:$0xff] %v173_v11  ;;  %208 = vst [vmem:[%s657_s30 + $0x8] sm:$0xff] %v174_v13  ;;  %p445_p3 = por %p444_p1, %p443_p12 }
  0x4c   : > { %400 = vtanh.f32 %v176_v12 }
  0x4d   : > { %p446_p4 = pnand %p445_p3, %p439_p10 }
  0x4f   : > { %449 = shalt.err (!%p446_p4)
}
  0x50   : > { %s450_s17 = scalar_lea.hbm %s671_s5, 256  ;;  %s454_s24 = scalar_lea.hbm %s736_s1, 2048 }
  0x51   : > { %p451_p6 = scmp.ne.s32.totalorder %s671_s5, %s450_s17  ;;  %p455_p2 = scmp.lt.u32.totalorder %s671_s5, %s736_s1 }
  0x52   : > { %p456_p5 = scmp.lt.u32.totalorder %s454_s24, %s450_s17  ;;  %p458_p8 = scmp.lt.u32.totalorder %s450_s17, %s671_s5 }
  0x53   : > { %p452_p7 = pnand %p451_p6, %p744_p11 }
  0x54   : > { %p457_p9 = por %p456_p5, %p455_p2 }
  0x55   : > { %p453_p0 = pneg %p452_p7 }
  0x56   : > { %p459_p13 = por %p458_p8, %p457_p9 }
  0x58   : > { %p460_p10 = pnand %p459_p13, %p453_p0 }
  0x5a   : > { %463 = shalt.err (!%p460_p10)
}
  0x5b   : > { %s526_s3 = smov 128   ;;  %s527_s4 = smov 8   ;;  %v399_v14 = vpop.eup %398  ;;  %v183_v17 = vld [vmem:[#allocation3] sm:$0xff]  ;;  %v184_v20 = vld [vmem:[#allocation3 + $0x8] sm:$0xff] }
  0x5c   : > { %332 = dma.vmem_to_hbm [thread:$0]  (%p744_p11), %s673_s27, 256, %s671_s5, %s210_s9, %s526_s3, %s526_s3, %s527_s4   ;;  %v401_v15 = vpop.eup %400  ;;  %v179_v16 = vmul.f32 0.5, %v399_v14 }
  0x5d   : > { %v180_v18 = vmul.f32 0.5, %v401_v15 }
  0x5e   : > { %v181_v19 = vadd.f32 0.5, %v179_v16 }
  0x5f   : > { %v182_v21 = vadd.f32 0.5, %v180_v18 }
  0x60   : > { %v185_v22 = vmul.f32 %v183_v17, %v181_v19 }
  0x61   : > { %v186_v23 = vmul.f32 %v184_v20, %v182_v21 }
  0x62   : > { %v187_v24 = vadd.f32 %v185_v22, %v173_v11 }
  0x63   : > { %v188_v25 = vadd.f32 %v186_v23, %v174_v13 }
  0x64   : > { %v189_v26 = vmul.f32 0.5, %v187_v24 }
  0x65   : > { %v190_v27 = vmul.f32 0.5, %v188_v25 }
  0x66   : > { %402 = vtanh.f32 %v189_v26 }
  0x67   : > { %404 = vtanh.f32 %v190_v27 }
  0x70   : > { %v403_v28 = vpop.eup %402 }
  0x71   : > { %v405_v29 = vpop.eup %404  ;;  %v193_v30 = vmul.f32 0.5, %v403_v28 }
  0x72   : > { %v194_v31 = vmul.f32 0.5, %v405_v29 }
  0x73   : > { %v195_v32 = vadd.f32 0.5, %v193_v30 }
  0x74   : > { %v196_v33 = vadd.f32 0.5, %v194_v31 }
  0x75   : > { %205 = vst [vmem:[#allocation3] sm:$0xff] %v195_v32  ;;  %v197_v34 = vadd.f32 1.0, %v195_v32 }
  0x76   : > { %206 = vst [vmem:[#allocation3 + $0x8] sm:$0xff] %v196_v33  ;;  %v198_v35 = vadd.f32 1.0, %v196_v33 }
  0x77   : > { %v199_v36 = vsel %vm171_vm0, %v197_v34, 0.0 }
  0x78   : > { %v201_v37 = vsub.f32 %v662_v7, %v199_v36  ;;  %v200_v38 = vsel %vm172_vm1, %v198_v35, 0.0 }
  0x79   : > { %v202_v39 = vsub.f32 %v664_v8, %v200_v38 }
  0x7a   : > { %203 = vst [vmem:[#allocation2] sm:$0xff] %v201_v37 }
  0x7b   : > { %204 = vst [vmem:[#allocation2 + $0x8] sm:$0xff] %v202_v39 }
  0x7c PF: > { %p343_p11 = scmp.ge.s32.totalorder %s518_s11, 2  ;;  %s240_s19 = sand.u32 1, %s498_s6  }
  0x7d   : > { %p745_p12 = scmp.ne.s32.totalorder %s741_s21, 0  ;;  %s241_s26 = scalar_lea.sflag [#allocation6], %s240_s19 }
  0x7f   : > { %p339_p1 = pnand %p343_p11, %p745_p12 }
  0x81   : > { %493 = dma.done.wait (!%p339_p1), %s241_s26, 256  }
  0x82   : > { %495 = vsyncadd (!%p339_p1), %s241_s26, 4294967040  ;;  %s17_s11 = sadd.s32 1, %s518_s11   ;;  %s746_s6 = smov %s502_s7 }
  0x83   : > { %p14_p3 = scmp.ge.s32.totalorder %s17_s11, 10   ;;  %s747_s7 = smov %s506_s8 }
  0x84   : > { %s748_s8 = smov %s594_s20  ;;  %s749_s9 = smov %s514_s10 }
  0x85   : > { %s750_s10 = smov %s752_s14  ;;  %16 = sbr.rel (!%p14_p3) target bundleno = 6 (0x6), region = 73 }
  0x8c   :  { %246 = vsyncpa [#allocation5], 1 }
  0x8d   :  { %248 = vsyncpa [#allocation5 + $0x1], 1 }
  0x8e   :  { %249 = vsyncpa [#allocation6], 1 }
  0x8f   :  { %251 = vsyncpa [#allocation6 + $0x1], 1 }

</bundles_post_ra>
